<compile_context>
chip_gen: v7x
topology: tpu7x:2x2x1
jax: 0.10.0
libtpu: 0.0.40
codegen_flags: <defaults>
</compile_context>

<pallas_src>
import jax
import jax.numpy as jnp
from jax.experimental import pallas as pl
from jax.experimental.pallas import tpu as pltpu


def dense_nn_single_kernel(x_ref, w1_ref, b1_ref, w2_ref, b2_ref, o_ref):
    # fc1 + ReLU: MXU matmul with f32 accumulation, VPU bias + relu.
    h = jnp.dot(x_ref[...], w1_ref[...], preferred_element_type=jnp.float32)
    h = jnp.maximum(h + b1_ref[...], 0.0)
    # TODO(synk): training-mode dropout (pltpu.prng_seed + stateful_bernoulli)
    # omitted; eval-mode dropout is the identity, matching module.eval().

    # classifier (hdim -> 1): an Hx1 MXU RHS would use a single output column,
    # so do it on the VPU (elementwise mul) + lane reduce against the (1, H)
    # w2 row. b2 is a scalar read from SMEM. The per-tile logits are written
    # lane-dense as a (1, tile_n) row (see header note on output layout).
    logit = jnp.sum(h * w2_ref[...], axis=-1) + b2_ref[0]
    o_ref[...] = logit.reshape(1, -1).astype(o_ref.dtype)


def _vmem_capacity_bytes():
    """VMEM capacity of the attached TPU generation (64 MiB/TC fallback)."""
    try:
        cap = getattr(pltpu.get_tpu_info(), "vmem_capacity_bytes", None)
        if cap:
            return int(cap)
    except Exception:
        pass
    return 64 * 1024 * 1024  # v7x per-TensorCore size: safe on every generation


def _pick_tile_n(n_rows, d, h, x_itemsize, vmem_budget):
    """D-aware batch tile: ~2 MiB x blocks, clamped to the batch & VMEM budget."""
    target = (2 * 1024 * 1024) // max(1, x_itemsize * d)
    tile = max(512, min(8192, target))             # 8192 cap bounds in-kernel h
    tile = max(128, (tile // 128) * 128)           # lane multiple
    tile = min(tile, 128 * pl.cdiv(n_rows, 128))   # never over-tile the batch

    def vmem_needed(t):
        x_buf = 2 * t * d * x_itemsize             # double-buffered x stream
        w_buf = d * h * 4                          # resident fc1 weights (1 buf)
        b_buf = 2 * 8 * max(h, 128) * 4            # b1 / w2 rows, (8,128)-padded
        o_buf = 2 * 8 * t * 4                      # (1, t) out block, padded
        work = 2 * t * h * 4                       # h intermediate / spill slack
        return x_buf + w_buf + b_buf + o_buf + work

    while tile > 128 and vmem_needed(tile) > vmem_budget:
        tile -= 128

    # v7x: keep >= 2 grid steps for batches worth splitting, so the "parallel"
    # batch axis can shard across both TensorCores (harmless on v5e/v6e).
    if pl.cdiv(n_rows, tile) == 1 and n_rows > 256:
        tile = max(128, 128 * pl.cdiv(pl.cdiv(n_rows, 2), 128))
    return tile


def _forward(x, w1, b1, w2, b2, tile_n, vmem_limit, single_buffer_weights):
    N, D = x.shape
    H = w1.shape[1]
    num_tiles = pl.cdiv(N, tile_n)

    # Constant index_map -> fetched once and VMEM-resident; single buffer
    # reclaims the second (useless) copy when supported by this JAX build.
    resident_kw = (
        dict(pipeline_mode=pl.Buffered(1)) if single_buffer_weights else {}
    )

    flops = 2 * N * D * H + 4 * N * H
    bytes_accessed = (
        N * D * x.dtype.itemsize          # one streaming read of x (no pad copy)
        + D * H * w1.dtype.itemsize       # weights fetched once
        + 4 * (2 * H + 1)                 # b1, w2, b2
        + 4 * num_tiles * tile_n          # lane-dense logit slab
    )

    out = pl.pallas_call(
        dense_nn_single_kernel,
        out_shape=jax.ShapeDtypeStruct((num_tiles, tile_n), jnp.float32),
        grid_spec=pltpu.PrefetchScalarGridSpec(
            num_scalar_prefetch=0,
            grid=(num_tiles,),
            in_specs=[
                # x: batch-tiled, double-buffered by the pipeline. The trailing
                # block is ragged; Pallas pads the edge read.
                # TODO(synk): sweep pipeline_mode=pl.Buffered(3) here on v5e if
                # the profile still shows exposed DMA after the larger tiles.
                pl.BlockSpec((tile_n, D), lambda i: (i, 0)),
                # Weights/biases: same block every step -> VMEM-resident.
                pl.BlockSpec((D, H), lambda i: (0, 0), **resident_kw),
                pl.BlockSpec((1, H), lambda i: (0, 0), **resident_kw),
                pl.BlockSpec((1, H), lambda i: (0, 0), **resident_kw),
                # b2: single scalar in SMEM (no padded VMEM tile / DMA).
                pl.BlockSpec(memory_space=pltpu.MemorySpace.SMEM),
            ],
            out_specs=pl.BlockSpec((1, tile_n), lambda i: (i, 0)),
        ),
        compiler_params=pltpu.CompilerParams(
            dimension_semantics=("parallel",),
            vmem_limit_bytes=vmem_limit,
        ),
        cost_estimate=pl.CostEstimate(
            flops=flops, transcendentals=0, bytes_accessed=bytes_accessed
        ),
    )(x, w1, b1.reshape(1, H), w2.reshape(1, H), b2.reshape(1))
    return out


def dense_nn_single(x, w1, b1, w2, b2, *, tile_n=None, stream_dtype=None):
    """x: [N, D]; w1: [D, H]; b1: [H]; w2: [H, 1]; b2: [1]  ->  [N] f32 logits."""
    N, D = x.shape
    H = w1.shape[1]

    if stream_dtype is not None:
        # Opt-in reduced-precision streaming of the HBM-dominant operands
        # (halves the dominant DMA traffic). Accumulation stays f32 in-kernel;
        # biases and the output stay f32. This is an accuracy tradeoff.
        x = x.astype(stream_dtype)
        w1 = w1.astype(stream_dtype)
    b1 = b1.astype(jnp.float32)
    w2 = w2.astype(jnp.float32)
    b2 = b2.astype(jnp.float32)

    vmem_budget = int(0.85 * _vmem_capacity_bytes())
    if tile_n is None:
        tile_n = _pick_tile_n(N, D, H, x.dtype.itemsize, vmem_budget)
    else:
        tile_n = max(128, (int(tile_n) // 128) * 128)
        tile_n = min(tile_n, 128 * pl.cdiv(N, 128))

    # TODO(synk): for very large D*H on v7x (64 MiB VMEM/TC), add an
    # "arbitrary" H-blocking grid axis with a (tile_n,) f32 scratch accumulator
    # instead of shrinking tile_n.

    try:
        out = _forward(x, w1, b1, w2, b2, tile_n, vmem_budget, True)
    except Exception:
        # Portability guard: BlockSpec.pipeline_mode / pl.Buffered is a newer
        # feature; fall back to default double-buffered weights (only costs one
        # extra copy of the small weight block in VMEM).
        out = _forward(x, w1, b1, w2, b2, tile_n, vmem_budget, False)

    # (num_tiles, tile_n) lane-dense slab -> (N,)   (== logit.squeeze()).
    # Entries past N come from the ragged trailing block and are unspecified;
    # they are discarded here and must never be fed into a reduction.
    return out.reshape(-1)[:N]


def init_params(key, input_dim, hdim):
    """Deterministic init mimicking torch.nn.Linear default U[-1/sqrt(fan_in), +]."""
    k1, k2, k3, k4 = jax.random.split(key, 4)
    bound1 = 1.0 / jnp.sqrt(jnp.float32(input_dim))
    bound2 = 1.0 / jnp.sqrt(jnp.float32(hdim))
    # stored pre-transposed: w1 is [input_dim, hdim], w2 is [hdim, 1]
    w1 = jax.random.uniform(k1, (input_dim, hdim), jnp.float32, -bound1, bound1)
    b1 = jax.random.uniform(k2, (hdim,), jnp.float32, -bound1, bound1)
    w2 = jax.random.uniform(k3, (hdim, 1), jnp.float32, -bound2, bound2)
    b2 = jax.random.uniform(k4, (1,), jnp.float32, -bound2, bound2)
    return w1, b1, w2, b2


if __name__ == "__main__":
    key = jax.random.PRNGKey(0)
    k_x1, k_x2, k_p = jax.random.split(key, 3)

    INPUT_DIM, HDIM = 32, 64
    w1, b1, w2, b2 = init_params(k_p, INPUT_DIM, HDIM)

    def reference(xx):
        # eval-mode dropout == identity
        return (jnp.maximum(xx @ w1 + b1, 0.0) @ w2 + b2).reshape(xx.shape[0])

    # 1) Small batch, f32 end-to-end (single ragged tile).
    N1 = 8
    x1 = jax.random.normal(k_x1, (N1, INPUT_DIM), jnp.float32)
    out1 = jax.block_until_ready(dense_nn_single(x1, w1, b1, w2, b2))
    assert out1.shape == (N1,)
    assert jnp.allclose(out1, reference(x1), atol=1e-5, rtol=1e-5)

    # 2) Multi-tile grid with a ragged trailing block + bf16 streaming of x/w1
    #    (loose tolerance for the reduced-precision path; f32 accumulation).
    N2 = 300
    x2 = jax.random.normal(k_x2, (N2, INPUT_DIM), jnp.float32)
    out2 = jax.block_until_ready(
        dense_nn_single(x2, w1, b1, w2, b2, stream_dtype=jnp.bfloat16)
    )
    assert out2.shape == (N2,)
    assert bool(jnp.all(jnp.isfinite(out2)))
    assert jnp.allclose(out2, reference(x2), atol=1e-1, rtol=1e-1)

    print("KERNEL_OK")
</pallas_src>

<mosaic_0001>
module attributes {stable_mosaic.version = 11 : i64} {
  func.func @dense_nn_single_kernel(%arg0: i32, %arg1: memref<128x32xf32, #tpu.memory_space<vmem>>, %arg2: memref<32x64xf32, #tpu.memory_space<vmem>>, %arg3: memref<1x64xf32, #tpu.memory_space<vmem>>, %arg4: memref<1x64xf32, #tpu.memory_space<vmem>>, %arg5: memref<1xf32, #tpu.memory_space<smem>>, %arg6: memref<1x128xf32, #tpu.memory_space<vmem>>) attributes {dimension_semantics = [#tpu.dimension_semantics<parallel>], iteration_bounds = array<i64: 1>, scalar_prefetch = 0 : i64, scratch_operands = 0 : i64, tpu.core_type = #tpu.core_type<tc>, window_params = [{transform_indices = @transform_0, window_bounds = array<i64: 128, 32>}, {pipeline_mode = #tpu.pipeline_mode<synchronous>, transform_indices = @transform_1, window_bounds = array<i64: 32, 64>}, {pipeline_mode = #tpu.pipeline_mode<synchronous>, transform_indices = @transform_2, window_bounds = array<i64: 1, 64>}, {pipeline_mode = #tpu.pipeline_mode<synchronous>, transform_indices = @transform_3, window_bounds = array<i64: 1, 64>}, {transform_indices = @transform_4, window_bounds = array<i64: 1>}, {transform_indices = @transform_5, window_bounds = array<i64: 1, 128>}]} {
    %c0 = arith.constant 0 : index
    %c0_0 = arith.constant 0 : index
    %0 = vector.load %arg1[%c0, %c0_0] : memref<128x32xf32, #tpu.memory_space<vmem>>, vector<128x32xf32>
    %c0_1 = arith.constant 0 : index
    %c0_2 = arith.constant 0 : index
    %1 = vector.load %arg2[%c0_1, %c0_2] : memref<32x64xf32, #tpu.memory_space<vmem>>, vector<32x64xf32>
    %cst = arith.constant dense<0.000000e+00> : vector<128x64xf32>
    %2 = tpu.matmul %0, %1, %cst {dimension_numbers = #tpu.dot_dimension_numbers<[1], [0], [0], [1], [0, 0, 1, 1], [], []>} : vector<128x32xf32>, vector<32x64xf32>, vector<128x64xf32> -> vector<128x64xf32>
    %c0_3 = arith.constant 0 : index
    %c0_4 = arith.constant 0 : index
    %3 = vector.load %arg3[%c0_3, %c0_4] : memref<1x64xf32, #tpu.memory_space<vmem>>, vector<1x64xf32>
    %4 = vector.broadcast %3 : vector<1x64xf32> to vector<128x64xf32>
    %5 = arith.addf %2, %4 : vector<128x64xf32>
    %cst_5 = arith.constant 0.000000e+00 : f32
    %6 = vector.broadcast %cst_5 : f32 to vector<128x64xf32>
    %7 = arith.maximumf %5, %6 : vector<128x64xf32>
    %c0_6 = arith.constant 0 : index
    %c0_7 = arith.constant 0 : index
    %8 = vector.load %arg4[%c0_6, %c0_7] : memref<1x64xf32, #tpu.memory_space<vmem>>, vector<1x64xf32>
    %9 = vector.broadcast %8 : vector<1x64xf32> to vector<128x64xf32>
    %10 = arith.mulf %7, %9 : vector<128x64xf32>
    %cst_8 = arith.constant dense<0.000000e+00> : vector<128xf32>
    %11 = vector.multi_reduction <add>, %10, %cst_8 [1] : vector<128x64xf32> to vector<128xf32>
    %c0_9 = arith.constant 0 : index
    %12 = memref.load %arg5[%c0_9] : memref<1xf32, #tpu.memory_space<smem>>
    %13 = vector.broadcast %12 : f32 to vector<128xf32>
    %14 = arith.addf %11, %13 : vector<128xf32>
    %15 = vector.shape_cast %14 : vector<128xf32> to vector<1x128xf32>
    %c0_10 = arith.constant 0 : index
    %c0_11 = arith.constant 0 : index
    %16 = vector.load %arg6[%c0_10, %c0_11] : memref<1x128xf32, #tpu.memory_space<vmem>>, vector<1x128xf32>
    tpu.vector_store %arg6[%c0_10, %c0_11], %15 {strides = array<i32>} : memref<1x128xf32, #tpu.memory_space<vmem>>, vector<1x128xf32>,
    return
  }
  func.func @transform_0(%arg0: i32) -> (i32, i32) {
    %c0_i32 = arith.constant 0 : i32
    %c0_i32_0 = arith.constant 0 : i32
    return %arg0, %c0_i32 : i32, i32
  }
  func.func @transform_1(%arg0: i32) -> (i32, i32) {
    %c0_i32 = arith.constant 0 : i32
    %c0_i32_0 = arith.constant 0 : i32
    %c0_i32_1 = arith.constant 0 : i32
    return %c0_i32, %c0_i32_0 : i32, i32
  }
  func.func @transform_2(%arg0: i32) -> (i32, i32) {
    %c0_i32 = arith.constant 0 : i32
    %c0_i32_0 = arith.constant 0 : i32
    %c0_i32_1 = arith.constant 0 : i32
    return %c0_i32, %c0_i32_0 : i32, i32
  }
  func.func @transform_3(%arg0: i32) -> (i32, i32) {
    %c0_i32 = arith.constant 0 : i32
    %c0_i32_0 = arith.constant 0 : i32
    %c0_i32_1 = arith.constant 0 : i32
    return %c0_i32, %c0_i32_0 : i32, i32
  }
  func.func @transform_4(%arg0: i32) -> i32 {
    %c0_i32 = arith.constant 0 : i32
    %c0_i32_0 = arith.constant 0 : i32
    return %c0_i32 : i32
  }
  func.func @transform_5(%arg0: i32) -> (i32, i32) {
    %c0_i32 = arith.constant 0 : i32
    %c0_i32_0 = arith.constant 0 : i32
    return %arg0, %c0_i32 : i32, i32
  }
}

module attributes {stable_mosaic.version = 11 : i64} {
  func.func @dense_nn_single_kernel(%arg0: i32, %arg1: memref<128x32xf32, #tpu.memory_space<vmem>>, %arg2: memref<32x64xf32, #tpu.memory_space<vmem>>, %arg3: memref<1x64xf32, #tpu.memory_space<vmem>>, %arg4: memref<1x64xf32, #tpu.memory_space<vmem>>, %arg5: memref<1xf32, #tpu.memory_space<smem>>, %arg6: memref<1x128xf32, #tpu.memory_space<vmem>>) attributes {dimension_semantics = [#tpu.dimension_semantics<parallel>], iteration_bounds = array<i64: 1>, scalar_prefetch = 0 : i64, scratch_operands = 0 : i64, tpu.core_type = #tpu.core_type<tc>, window_params = [{transform_indices = @transform_0, window_bounds = array<i64: 128, 32>}, {pipeline_mode = #tpu.pipeline_mode<synchronous>, transform_indices = @transform_1, window_bounds = array<i64: 32, 64>}, {pipeline_mode = #tpu.pipeline_mode<synchronous>, transform_indices = @transform_2, window_bounds = array<i64: 1, 64>}, {pipeline_mode = #tpu.pipeline_mode<synchronous>, transform_indices = @transform_3, window_bounds = array<i64: 1, 64>}, {transform_indices = @transform_4, window_bounds = array<i64: 1>}, {transform_indices = @transform_5, window_bounds = array<i64: 1, 128>}]} {
    %c0 = arith.constant 0 : index
    %c0_0 = arith.constant 0 : index
    %0 = vector.load %arg1[%c0, %c0_0] : memref<128x32xf32, #tpu.memory_space<vmem>>, vector<128x32xf32>
    %c0_1 = arith.constant 0 : index
    %c0_2 = arith.constant 0 : index
    %1 = vector.load %arg2[%c0_1, %c0_2] : memref<32x64xf32, #tpu.memory_space<vmem>>, vector<32x64xf32>
    %cst = arith.constant dense<0.000000e+00> : vector<128x64xf32>
    %2 = tpu.matmul %0, %1, %cst {dimension_numbers = #tpu.dot_dimension_numbers<[1], [0], [0], [1], [0, 0, 1, 1], [], []>} : vector<128x32xf32>, vector<32x64xf32>, vector<128x64xf32> -> vector<128x64xf32>
    %c0_3 = arith.constant 0 : index
    %c0_4 = arith.constant 0 : index
    %3 = vector.load %arg3[%c0_3, %c0_4] : memref<1x64xf32, #tpu.memory_space<vmem>>, vector<1x64xf32>
    %4 = vector.broadcast %3 : vector<1x64xf32> to vector<128x64xf32>
    %5 = arith.addf %2, %4 : vector<128x64xf32>
    %cst_5 = arith.constant 0.000000e+00 : f32
    %6 = vector.broadcast %cst_5 : f32 to vector<128x64xf32>
    %7 = arith.maximumf %5, %6 : vector<128x64xf32>
    %c0_6 = arith.constant 0 : index
    %c0_7 = arith.constant 0 : index
    %8 = vector.load %arg4[%c0_6, %c0_7] : memref<1x64xf32, #tpu.memory_space<vmem>>, vector<1x64xf32>
    %9 = vector.broadcast %8 : vector<1x64xf32> to vector<128x64xf32>
    %10 = arith.mulf %7, %9 : vector<128x64xf32>
    %cst_8 = arith.constant dense<0.000000e+00> : vector<128xf32>
    %11 = vector.multi_reduction <add>, %10, %cst_8 [1] : vector<128x64xf32> to vector<128xf32>
    %c0_9 = arith.constant 0 : index
    %12 = memref.load %arg5[%c0_9] : memref<1xf32, #tpu.memory_space<smem>>
    %13 = vector.broadcast %12 : f32 to vector<128xf32>
    %14 = arith.addf %11, %13 : vector<128xf32>
    %15 = vector.shape_cast %14 : vector<128xf32> to vector<1x128xf32>
    %c0_10 = arith.constant 0 : index
    %c0_11 = arith.constant 0 : index
    %16 = vector.load %arg6[%c0_10, %c0_11] : memref<1x128xf32, #tpu.memory_space<vmem>>, vector<1x128xf32>
    tpu.vector_store %arg6[%c0_10, %c0_11], %15 {strides = array<i32>} : memref<1x128xf32, #tpu.memory_space<vmem>>, vector<1x128xf32>,
    return
  }
  func.func @transform_0(%arg0: i32) -> (i32, i32) {
    %c0_i32 = arith.constant 0 : i32
    %c0_i32_0 = arith.constant 0 : i32
    return %arg0, %c0_i32 : i32, i32
  }
  func.func @transform_1(%arg0: i32) -> (i32, i32) {
    %c0_i32 = arith.constant 0 : i32
    %c0_i32_0 = arith.constant 0 : i32
    %c0_i32_1 = arith.constant 0 : i32
    return %c0_i32, %c0_i32_0 : i32, i32
  }
  func.func @transform_2(%arg0: i32) -> (i32, i32) {
    %c0_i32 = arith.constant 0 : i32
    %c0_i32_0 = arith.constant 0 : i32
    %c0_i32_1 = arith.constant 0 : i32
    return %c0_i32, %c0_i32_0 : i32, i32
  }
  func.func @transform_3(%arg0: i32) -> (i32, i32) {
    %c0_i32 = arith.constant 0 : i32
    %c0_i32_0 = arith.constant 0 : i32
    %c0_i32_1 = arith.constant 0 : i32
    return %c0_i32, %c0_i32_0 : i32, i32
  }
  func.func @transform_4(%arg0: i32) -> i32 {
    %c0_i32 = arith.constant 0 : i32
    %c0_i32_0 = arith.constant 0 : i32
    return %c0_i32 : i32
  }
  func.func @transform_5(%arg0: i32) -> (i32, i32) {
    %c0_i32 = arith.constant 0 : i32
    %c0_i32_0 = arith.constant 0 : i32
    return %arg0, %c0_i32 : i32, i32
  }
}

</mosaic_0001>

<bundles_post_ra>
// kernel: tpu_custom_call.1
= control target key start
LH: loop header
LB: loop body
LE: loop exit
PB: predicated region body
PF: predicated region fallthrough
CT: control target
= control target key end

     0   :  { %11 = vsyncpa [#allocation4], 0  ;;  %s908_s0 = inlined_call_operand.hbm [shape: f32[8,32], index: 0, kind: input, shape index: {}]   ;;  %s909_s1 = inlined_call_operand.hbm [shape: f32[32,64], index: 1, kind: input, shape index: {}]   ;;  %s910_s2 = inlined_call_operand.vmem [shape: f32[1,64], index: 2, kind: input, shape index: {}]   ;;  %s911_s3 = inlined_call_operand.vmem [shape: f32[1,64], index: 3, kind: input, shape index: {}]   ;;  %s912_s4 = inlined_call_operand.<no memory space> [shape: f32[1], index: 4, kind: input, shape index: {}]   ;;  %s913_s5 = inlined_call_operand.hbm [shape: f32[1,128], index: 5, kind: output, shape index: {}]  }
   0x1   :  { %12 = vsyncpa [#allocation7], 0 }
   0x2   :  { %13 = vsyncpa [#allocation5], 0 }
   0x3   :  { %18 = vsyncadd [#allocation4], 1920  ;;  %s681_s18 = smov [#allocation3]   ;;  %s609_s22 = scalar_lea.hbm %s908_s0, 128 }
   0x4   :  { %s19_s19 = sshll.u32 %s681_s18, 4  ;;  %p610_p0 = scmp.ne.s32.totalorder %s908_s0, %s609_s22  ;;  %s20_s19 = int_to_ptr.vmem [resolvable:$true] %s19_s19 }
   0x5   :  { %p613_p1 = scmp.lt.u32.totalorder %s609_s22, %s908_s0 }
   0x7   :  { %p615_p2 = pnand %p613_p1, %p610_p0 }
   0x9   :  { %618 = shalt.err (!%p615_p2)
}
   0xa   :  { %s619_s27 = scalar_lea.vmem %s20_s19, 128  ;;  %s623_s28 = scalar_lea.vmem %s20_s19, 2048 }
   0xb   :  { %p620_p3 = scmp.ne.s32.totalorder %s20_s19, %s619_s27  ;;  %p624_p4 = scmp.lt.s32.totalorder %s20_s19, %s20_s19 }
   0xc   :  { %p625_p5 = scmp.lt.s32.totalorder %s623_s28, %s619_s27 }
   0xe   :  { %p626_p6 = por %p625_p5, %p624_p4 }
  0x10   :  { %p627_p7 = pnand %p626_p6, %p620_p3 }
  0x12   :  { %630 = shalt.err (!%p627_p7)
}
  0x13   :  { %s682_s29 = smov 128   ;;  %s683_s30 = smov 8  }
  0x14   :  { %25 = dma.hbm_to_vmem [thread:$0]  %s908_s0, 128, %s20_s19, [#allocation4], %s682_s29, %s682_s29, %s683_s30  }
  0x15   :  { %s684_s8 = smov [#allocation6]   ;;  %s631_s12 = scalar_lea.hbm %s909_s1, 512 }
  0x16   :  { %s31_s9 = sshll.u32 %s684_s8, 4  ;;  %p632_p8 = scmp.ne.s32.totalorder %s909_s1, %s631_s12  ;;  %s32_s9 = int_to_ptr.vmem [resolvable:$true] %s31_s9 }
  0x17   :  { %p635_p9 = scmp.lt.u32.totalorder %s631_s12, %s909_s1 }
  0x19   :  { %p637_p10 = pnand %p635_p9, %p632_p8 }
  0x1b   :  { %640 = shalt.err (!%p637_p10)
}
  0x1c   :  { %s641_s17 = scalar_lea.vmem %s32_s9, 512  ;;  %p646_p12 = scmp.lt.s32.totalorder %s32_s9, %s32_s9 }
  0x1d   :  { %p642_p11 = scmp.ne.s32.totalorder %s32_s9, %s641_s17  ;;  %p647_p13 = scmp.lt.s32.totalorder %s641_s17, %s641_s17 }
  0x1f   :  { %p648_p0 = por %p647_p13, %p646_p12 }
  0x21   :  { %p649_p1 = pnand %p648_p0, %p642_p11 }
  0x23   :  { %652 = shalt.err (!%p649_p1)
}
  0x24   :  { %37 = dma.hbm_to_vmem [thread:$0]  %s909_s1, 512, %s32_s9, [#allocation7], %s682_s29, %s682_s29, %s683_s30  }
  0x25   :  { %675 = dma.done.wait [#allocation4], 2048  }
  0x26   :  { %676 = vsyncadd [#allocation4], 4294965248 }
  0x27   :  { %677 = dma.done.wait [#allocation7], 512  }
  0x28   :  { %678 = vsyncadd [#allocation7], 4294966784  ;;  %vm77_vm0 = vcmask 261120   ;;  %v66_v0 = vld [vmem:[#allocation6] sm:$0xff]  ;;  %v67_v1 = vld [vmem:[#allocation6 + $0x8] sm:$0xff]  ;;  %vm310_vm1 = vcmask 523264  }
  0x29   :  { %v68_v2 = vld [vmem:[#allocation6 + $0x10] sm:$0xff]  ;;  %v592_v3 = vpack.c.bf16 %v67_v1, %v66_v0  ;;  %v69_v4 = vld [vmem:[#allocation6 + $0x18] sm:$0xff]  ;;  %v50_v5 = vld [vmem:[#allocation3] sm:$0xff]  ;;  %vm404_vm2 = vcmask 130112   ;;  %vm411_vm3 = vcmask 195712   ;;  %vm418_vm4 = vcmask 261312  }
  0x2a   :  { %v58_v6 = vld [vmem:[#allocation3 + $0x40] sm:$0xff]  ;;  %v596_v7 = vpack.c.bf16 %v69_v4, %v68_v2  ;;  %568 = vmatprep.mubr.msk.f32.mxu0 %vm77_vm0, %v50_v5  ;;  %v51_v8 = vld [vmem:[#allocation3 + $0x8] sm:$0xff]  ;;  %v52_v10 = vld [vmem:[#allocation3 + $0x10] sm:$0xff]  ;;  %vm425_vm5 = vcmask 326912   ;;  %vm432_vm6 = vcmask 392512   ;;  %vm439_vm7 = vcmask 458112  }
  0x2b   :  { %580 = vmatprep.mubr.msk.f32.mxu1 %vm77_vm0, %v58_v6  ;;  %593 = vmatprep.subr.bf16.mxu0 %v592_v3  ;;  %v59_v9 = vld [vmem:[#allocation3 + $0x48] sm:$0xff]  ;;  %v60_v11 = vld [vmem:[#allocation3 + $0x50] sm:$0xff]  ;;  %v53_v12 = vld [vmem:[#allocation3 + $0x18] sm:$0xff]  ;;  %vm446_vm8 = vcmask 523712   ;;  %vm453_vm9 = vcmask 589312   ;;  %vm460_vm10 = vcmask 654912  }
  0x2c   :  { %600 = vmatprep.subr.bf16.mxu1 %v592_v3  ;;  %595 = vmatpush3.bf16.msra.mxu0 %v592_v3  ;;  %v61_v13 = vld [vmem:[#allocation3 + $0x58] sm:$0xff]  ;;  %v54_v14 = vld [vmem:[#allocation3 + $0x20] sm:$0xff]  ;;  %v55_v16 = vld [vmem:[#allocation3 + $0x28] sm:$0xff]  ;;  %vm467_vm11 = vcmask 720512   ;;  %vm474_vm12 = vcmask 786112   ;;  %vm481_vm13 = vcmask 851712  }
  0x2d   :  { %602 = vmatpush3.bf16.msra.mxu1 %v592_v3  ;;  %597 = vmatprep.subr.bf16.mxu0 %v596_v7  ;;  %v62_v15 = vld [vmem:[#allocation3 + $0x60] sm:$0xff]  ;;  %v63_v17 = vld [vmem:[#allocation3 + $0x68] sm:$0xff]  ;;  %v56_v18 = vld [vmem:[#allocation3 + $0x30] sm:$0xff]  ;;  %vm488_vm14 = vcmask 917312   ;;  %vm495_vm15 = vcmask 982912  }
  0x2e   :  { %601 = vmatprep.subr.bf16.mxu1 %v596_v7  ;;  %v64_v19 = vld [vmem:[#allocation3 + $0x70] sm:$0xff]  ;;  %v57_v20 = vld [vmem:[#allocation3 + $0x38] sm:$0xff]  ;;  %v759_v22 = vld [vmem:[%s910_s2] ss:$0 sm:$0xff] }
  0x2f   :  { %v65_v21 = vld [vmem:[#allocation3 + $0x78] sm:$0xff]  ;;  %v768_v31 = vld [vmem:[%s911_s3] ss:$0 sm:$0xff] }
  0x30   :  { %599 = vmatpush3.bf16.msra.mxu0 %v596_v7 }
  0x31   :  { %603 = vmatpush3.bf16.msra.mxu1 %v596_v7 }
  0x33   :  { %569 = vmatmul.mubr.msk.f32.vlgmr.msra.gmra.mrb[0].mxu0 %vm77_vm0, %v51_v8 }
  0x34   :  { %581 = vmatmul.mubr.msk.f32.vlgmr.msra.gmra.mrb[0].mxu1 %vm77_vm0, %v59_v9  ;;  %571 = vmatprep.mubr.msk.f32.mxu0 %vm77_vm0, %v52_v10 }
  0x35   :  { %583 = vmatprep.mubr.msk.f32.mxu1 %vm77_vm0, %v60_v11 }
  0x37   :  { %572 = vmatmul.mubr.msk.f32.gmra.mrb[2].mxu0 %vm77_vm0, %v53_v12 }
  0x38   :  { %584 = vmatmul.mubr.msk.f32.gmra.mrb[2].mxu1 %vm77_vm0, %v61_v13  ;;  %574 = vmatprep.mubr.msk.f32.mxu0 %vm77_vm0, %v54_v14 }
  0x39   :  { %586 = vmatprep.mubr.msk.f32.mxu1 %vm77_vm0, %v62_v15 }
  0x3b   :  { %575 = vmatmul.mubr.msk.f32.gmra.mrb[4].mxu0 %vm77_vm0, %v55_v16 }
  0x3c   :  { %587 = vmatmul.mubr.msk.f32.gmra.mrb[4].mxu1 %vm77_vm0, %v63_v17  ;;  %577 = vmatprep.mubr.msk.f32.mxu0 %vm77_vm0, %v56_v18 }
  0x3d   :  { %589 = vmatprep.mubr.msk.f32.mxu1 %vm77_vm0, %v64_v19 }
  0x3f   :  { %578 = vmatmul.mubr.msk.f32.gmra.mrb[6].mxu0 %vm77_vm0, %v57_v20 }
  0x40   :  { %590 = vmatmul.mubr.msk.f32.gmra.mrb[6].mxu1 %vm77_vm0, %v65_v21  ;;  %vm502_vm0 = vcmask 1048512  }
 0x106   :  { %v570_v23 = vpop.f32.mrb[0].mxu0 }
 0x107   :  { %v582_v24 = vpop.f32.mrb[0].mxu1  ;;  %v198_v25 = vadd.f32 %v570_v23, %v759_v22  ;;  %v192_v27 = vpop.f32.mrb[1].mxu0 }
 0x108   :  { %v238_v26 = vadd.f32 %v582_v24, %v759_v22  ;;  %v232_v28 = vpop.f32.mrb[1].mxu1  ;;  %v193_v29 = vadd.f32 %v759_v22, %v192_v27 }
 0x109   :  { %v233_v30 = vadd.f32 %v759_v22, %v232_v28  ;;  %v272_v32 = vmax.f32 %v198_v25, 0.0 }
 0x10a   :  { %v280_v33 = vmax.f32 %v238_v26, 0.0  ;;  %v271_v34 = vmax.f32 %v193_v29, 0.0  ;;  %v573_v35 = vpop.f32.mrb[2].mxu0 }
 0x10b   :  { %v585_v36 = vpop.f32.mrb[2].mxu1  ;;  %v208_v37 = vadd.f32 %v573_v35, %v759_v22  ;;  %v202_v38 = vpop.f32.mrb[3].mxu0  ;;  %v295_v41 = vmul.f32 %v768_v31, %v272_v32  ;;  %v279_v43 = vmax.f32 %v233_v30, 0.0 }
 0x10c   :  { %v303_v39 = vmul.f32 %v768_v31, %v280_v33  ;;  %v248_v40 = vadd.f32 %v585_v36, %v759_v22  ;;  %v242_v42 = vpop.f32.mrb[3].mxu1  ;;  %v203_v44 = vadd.f32 %v759_v22, %v202_v38  ;;  %v294_v46 = vmul.f32 %v768_v31, %v271_v34 }
 0x10d   :  { %v243_v45 = vadd.f32 %v759_v22, %v242_v42  ;;  %v274_v47 = vmax.f32 %v208_v37, 0.0  ;;  %v314_v50 = vsel %vm310_vm1, %v295_v41, 0.0  ;;  %v302_v59 = vmul.f32 %v768_v31, %v279_v43 }
 0x10e   :  { %v338_v48 = vsel %vm310_vm1, %v303_v39, 0.0  ;;  %v282_v49 = vmax.f32 %v248_v40, 0.0  ;;  %315 = vadd.xlane.f32.xlu0 %v314_v50  ;;  %v576_v51 = vpop.f32.mrb[4].mxu0  ;;  %v273_v60 = vmax.f32 %v203_v44, 0.0  ;;  %v311_v63 = vsel %vm310_vm1, %v294_v46, 0.0 }
 0x10f   :  { %339 = vadd.xlane.f32.xlu1 %v338_v48  ;;  %v588_v52 = vpop.f32.mrb[4].mxu1  ;;  %v297_v53 = vmul.f32 %v768_v31, %v274_v47  ;;  %v218_v54 = vadd.f32 %v576_v51, %v759_v22  ;;  %v212_v55 = vpop.f32.mrb[5].mxu0  ;;  %v281_v61 = vmax.f32 %v243_v45, 0.0  ;;  %v335_v9 = vsel %vm310_vm1, %v302_v59, 0.0 }
 0x110   :  { %v305_v56 = vmul.f32 %v768_v31, %v282_v49  ;;  %v252_v57 = vpop.f32.mrb[5].mxu1  ;;  %v213_v58 = vadd.f32 %v759_v22, %v212_v55  ;;  %v296_v10 = vmul.f32 %v768_v31, %v273_v60  ;;  %v258_v12 = vadd.f32 %v588_v52, %v759_v22 }
 0x111   :  { %v320_v62 = vsel %vm310_vm1, %v297_v53, 0.0  ;;  %v276_v2 = vmax.f32 %v218_v54, 0.0  ;;  %v304_v11 = vmul.f32 %v768_v31, %v281_v61  ;;  %v253_v13 = vadd.f32 %v759_v22, %v252_v57 }
 0x112   :  { %312 = vadd.xlane.f32.xlu0 %v311_v63  ;;  %v579_v0 = vpop.f32.mrb[6].mxu0  ;;  %v275_v3 = vmax.f32 %v213_v58, 0.0  ;;  %v344_v4 = vsel %vm310_vm1, %v305_v56, 0.0  ;;  %v317_v18 = vsel %vm310_vm1, %v296_v10, 0.0  ;;  %v284_v20 = vmax.f32 %v258_v12, 0.0 }
 0x113   :  { %321 = vadd.xlane.f32.xlu1 %v320_v62  ;;  %v591_v1 = vpop.f32.mrb[6].mxu1  ;;  %v228_v5 = vadd.f32 %v579_v0, %v759_v22  ;;  %v222_v6 = vpop.f32.mrb[7].mxu0  ;;  %v299_v16 = vmul.f32 %v768_v31, %v276_v2  ;;  %v341_v19 = vsel %vm310_vm1, %v304_v11, 0.0  ;;  %v283_v21 = vmax.f32 %v253_v13, 0.0 }
 0x114   :  { %v262_v7 = vpop.f32.mrb[7].mxu1  ;;  %v223_v8 = vadd.f32 %v759_v22, %v222_v6  ;;  %v298_v17 = vmul.f32 %v768_v31, %v275_v3  ;;  %v268_v23 = vadd.f32 %v591_v1, %v759_v22  ;;  %v307_v29 = vmul.f32 %v768_v31, %v284_v20 }
 0x115   :  { %v278_v14 = vmax.f32 %v228_v5, 0.0  ;;  %v263_v24 = vadd.f32 %v759_v22, %v262_v7  ;;  %v326_v25 = vsel %vm310_vm1, %v299_v16, 0.0  ;;  %v306_v30 = vmul.f32 %v768_v31, %v283_v21 }
 0x116   :  { %336 = vadd.xlane.f32.xlu0 %v335_v9  ;;  %v277_v15 = vmax.f32 %v223_v8, 0.0  ;;  %v323_v26 = vsel %vm310_vm1, %v298_v17, 0.0  ;;  %v286_v32 = vmax.f32 %v268_v23, 0.0  ;;  %v350_v35 = vsel %vm310_vm1, %v307_v29, 0.0 }
 0x117   :  { %345 = vadd.xlane.f32.xlu1 %v344_v4  ;;  %v301_v27 = vmul.f32 %v768_v31, %v278_v14  ;;  %v285_v33 = vmax.f32 %v263_v24, 0.0  ;;  %v347_v36 = vsel %vm310_vm1, %v306_v30, 0.0  ;;  %v393_v41 = vlaneseq }
 0x118   :  { %v300_v28 = vmul.f32 %v768_v31, %v277_v15  ;;  %v309_v37 = vmul.f32 %v768_v31, %v286_v32  ;;  %v824_v48 = vstv %s912_s4  ;;  %s685_s4 = smov [#allocation8]  }
 0x119   :  { %v332_v34 = vsel %vm310_vm1, %v301_v27, 0.0  ;;  %v308_v38 = vmul.f32 %v768_v31, %v285_v33  ;;  %v816_v44 = vand.u32 127, %v393_v41  ;;  %v818_v47 = vshrl.u32 %v393_v41, 7  ;;  %s512_s22 = sshll.u32 %s685_s4, 4  ;;  %s513_s22 = int_to_ptr.vmem [resolvable:$true] %s512_s22 }
 0x11a   :  { %342 = vadd.xlane.f32.xlu0 %v341_v19  ;;  %v329_v22 = vsel %vm310_vm1, %v300_v28, 0.0  ;;  %v356_v39 = vsel %vm310_vm1, %v309_v37, 0.0  ;;  %s653_s23 = scalar_lea.vmem %s513_s22, 16  ;;  %s657_s24 = scalar_lea.vmem %s513_s22, 32 }
 0x11b   :  { %318 = vadd.xlane.f32.xlu1 %v317_v18  ;;  %v353_v40 = vsel %vm310_vm1, %v308_v38, 0.0  ;;  %v399_v31 = vadd.s32 4294967288, %v816_v44  ;;  %v406_v49 = vadd.s32 4294967280, %v816_v44  ;;  %v397_v50 = vsub.s32 %v816_v44, %v818_v47  ;;  %p654_p2 = scmp.ne.s32.totalorder %s513_s22, %s653_s23  ;;  %p658_p3 = scmp.lt.s32.totalorder %s513_s22, %s513_s22 }
 0x11c   :  { %v833_v54 = vadd.s32 4294967224, %v816_v44  ;;  %v413_v55 = vadd.s32 4294967272, %v816_v44  ;;  %v839_v58 = vadd.s32 4294967232, %v816_v44  ;;  %v420_v60 = vadd.s32 4294967264, %v816_v44  ;;  %p659_p4 = scmp.lt.s32.totalorder %s657_s24, %s653_s23 }
 0x11d   :  { %v402_v56 = vsub.s32 %v399_v31, %v818_v47  ;;  %v409_v59 = vsub.s32 %v406_v49, %v818_v47  ;;  %v844_v62 = vadd.s32 4294967208, %v816_v44  ;;  %v847_v0 = vadd.s32 4294967216, %v816_v44 }
 0x11e   :  { %324 = vadd.xlane.f32.xlu0 %v323_v26  ;;  %v427_v2 = vadd.s32 4294967256, %v816_v44  ;;  %v458_v3 = vsub.s32 %v833_v54, %v818_v47  ;;  %v416_v4 = vsub.s32 %v413_v55, %v818_v47  ;;  %v441_v8 = vadd.s32 4294967240, %v816_v44  ;;  %p660_p5 = por %p659_p4, %p658_p3 }
 0x11f   :  { %327 = vadd.xlane.f32.xlu1 %v326_v25  ;;  %v451_v9 = vsub.s32 %v839_v58, %v818_v47  ;;  %v423_v11 = vsub.s32 %v420_v60, %v818_v47  ;;  %v434_v12 = vadd.s32 4294967248, %v816_v44  ;;  %v472_v14 = vsub.s32 %v844_v62, %v818_v47 }
 0x120   :  { %v465_v15 = vsub.s32 %v847_v0, %v818_v47  ;;  %v430_v16 = vsub.s32 %v427_v2, %v818_v47  ;;  %v444_v24 = vsub.s32 %v441_v8, %v818_v47  ;;  %v483_v25 = vadd.s32 4294967192, %v816_v44  ;;  %p661_p6 = pnand %p660_p5, %p654_p2 }
 0x121   :  { %v437_v27 = vsub.s32 %v434_v12, %v818_v47  ;;  %v476_v33 = vadd.s32 4294967200, %v816_v44 }
 0x122   :  { %330 = vadd.xlane.f32.xlu0 %v329_v22  ;;  %v486_v38 = vsub.s32 %v483_v25, %v818_v47 }
 0x123   :  { %333 = vadd.xlane.f32.xlu1 %v332_v34 }
 0x126   :  { %348 = vadd.xlane.f32.xlu0 %v347_v36 }
 0x127   :  { %351 = vadd.xlane.f32.xlu1 %v350_v35 }
 0x12a   :  { %354 = vadd.xlane.f32.xlu0 %v353_v40 }
 0x12b   :  { %357 = vadd.xlane.f32.xlu1 %v356_v39  ;;  %v497_v39 = vadd.s32 4294967176, %v816_v44 }
 0x12d   :  { %v500_v58 = vsub.s32 %v497_v39, %v818_v47 }
 0x19b   :  { %v316_v43 = vpop.xlane.xlu0 %315 }
 0x19c   :  { %v814_v42 = vpop.xlane.xlu1 %339  ;;  %v362_v57 = vadd.f32 %v824_v48, %v316_v43 }
 0x19d   :  { %v370_v37 = vadd.f32 %v824_v48, %v814_v42  ;;  %v479_v42 = vsub.s32 %v476_v33, %v818_v47 }
 0x19e   :  { %v403_v6 = vrot.slane %v362_v57, %v402_v56 }
 0x19f   :  { %v313_v46 = vpop.xlane.xlu0 %312  ;;  %v459_v55 = vrot.slane %v370_v37, %v458_v3 }
 0x1a0   :  { %v322_v45 = vpop.xlane.xlu1 %321  ;;  %v361_v51 = vadd.f32 %v824_v48, %v313_v46 }
 0x1a1   :  { %v364_v7 = vadd.f32 %v824_v48, %v322_v45  ;;  %v490_v45 = vadd.s32 4294967184, %v816_v44 }
 0x1a2   :  { %v398_v61 = vrot.slane %v361_v51, %v397_v50 }
 0x1a3   :  { %v337_v53 = vpop.xlane.xlu0 %336  ;;  %v417_v23 = vrot.slane %v364_v7, %v416_v4 }
 0x1a4   :  { %v830_v52 = vpop.xlane.xlu1 %345  ;;  %v405_v13 = vsel %vm404_vm2, %v403_v6, %v398_v61  ;;  %v369_v34 = vadd.f32 %v824_v48, %v337_v53 }
 0x1a5   :  { %v372_v46 = vadd.f32 %v824_v48, %v830_v52 }
 0x1a6   :  { %v452_v51 = vrot.slane %v369_v34, %v451_v9 }
 0x1a7   :  { %v343_v1 = vpop.xlane.xlu0 %342  ;;  %v473_v60 = vrot.slane %v372_v46, %v472_v14 }
 0x1a8   :  { %v319_v63 = vpop.xlane.xlu1 %318  ;;  %v371_v40 = vadd.f32 %v824_v48, %v343_v1 }
 0x1a9   :  { %v363_v5 = vadd.f32 %v824_v48, %v319_v63 }
 0x1aa   :  { %v466_v52 = vrot.slane %v371_v40, %v465_v15 }
 0x1ab   :  { %v410_v10 = vrot.slane %v363_v5, %v409_v59  ;;  %v325_v18 = vpop.xlane.xlu0 %324  ;;  %v493_v59 = vsub.s32 %v490_v45, %v818_v47 }
 0x1ac   :  { %v328_v17 = vpop.xlane.xlu1 %327  ;;  %v365_v21 = vadd.f32 %v824_v48, %v325_v18 }
 0x1ad   :  { %v412_v19 = vsel %vm411_vm3, %v410_v10, %v405_v13  ;;  %v366_v20 = vadd.f32 %v824_v48, %v328_v17 }
 0x1ae   :  { %v424_v26 = vrot.slane %v365_v21, %v423_v11  ;;  %v419_v29 = vsel %vm418_vm4, %v417_v23, %v412_v19 }
 0x1af   :  { %v431_v28 = vrot.slane %v366_v20, %v430_v16  ;;  %v331_v32 = vpop.xlane.xlu0 %330 }
 0x1b0   :  { %v334_v30 = vpop.xlane.xlu1 %333  ;;  %v426_v22 = vsel %vm425_vm5, %v424_v26, %v419_v29  ;;  %v367_v36 = vadd.f32 %v824_v48, %v331_v32 }
 0x1b1   :  { %v368_v35 = vadd.f32 %v824_v48, %v334_v30  ;;  %v433_v31 = vsel %vm432_vm6, %v431_v28, %v426_v22 }
 0x1b2   :  { %v438_v43 = vrot.slane %v367_v36, %v437_v27 }
 0x1b3   :  { %v445_v41 = vrot.slane %v368_v35, %v444_v24  ;;  %v349_v50 = vpop.xlane.xlu0 %348 }
 0x1b4   :  { %v352_v49 = vpop.xlane.xlu1 %351  ;;  %v440_v53 = vsel %vm439_vm7, %v438_v43, %v433_v31  ;;  %v373_v54 = vadd.f32 %v824_v48, %v349_v50 }
 0x1b5   :  { %v447_v56 = vsel %vm446_vm8, %v445_v41, %v440_v53  ;;  %v374_v44 = vadd.f32 %v824_v48, %v352_v49 }
 0x1b6   :  { %v454_v57 = vsel %vm453_vm9, %v452_v51, %v447_v56  ;;  %v480_v1 = vrot.slane %v373_v54, %v479_v42 }
 0x1b7   :  { %v461_v61 = vsel %vm460_vm10, %v459_v55, %v454_v57  ;;  %v355_v63 = vpop.xlane.xlu0 %354  ;;  %v487_v4 = vrot.slane %v374_v44, %v486_v38 }
 0x1b8   :  { %v358_v62 = vpop.xlane.xlu1 %357  ;;  %v468_v0 = vsel %vm467_vm11, %v466_v52, %v461_v61  ;;  %v375_v3 = vadd.f32 %v824_v48, %v355_v63 }
 0x1b9   :  { %v376_v2 = vadd.f32 %v824_v48, %v358_v62  ;;  %v475_v5 = vsel %vm474_vm12, %v473_v60, %v468_v0 }
 0x1ba   :  { %v482_v47 = vsel %vm481_vm13, %v480_v1, %v475_v5  ;;  %v494_v7 = vrot.slane %v375_v3, %v493_v59 }
 0x1bb   :  { %v501_v6 = vrot.slane %v376_v2, %v500_v58  ;;  %v489_v8 = vsel %vm488_vm14, %v487_v4, %v482_v47 }
 0x1bc   :  { %v496_v9 = vsel %vm495_vm15, %v494_v7, %v489_v8 }
 0x1bd   :  { %v503_v10 = vsel %vm502_vm0, %v501_v6, %v496_v9 }
 0x1be   :  { %505 = vst [vmem:[#allocation8] sm:$0x1] %v503_v10 }
 0x1bf   :  { %664 = shalt.err (!%p661_p6)
}
 0x1c0   :  { %s665_s27 = scalar_lea.hbm %s913_s5, 16 }
 0x1c1   :  { %p666_p7 = scmp.ne.s32.totalorder %s913_s5, %s665_s27  ;;  %p669_p8 = scmp.lt.u32.totalorder %s665_s27, %s913_s5 }
 0x1c3   :  { %p671_p9 = pnand %p669_p8, %p666_p7 }
 0x1c5   :  { %674 = shalt.err (!%p671_p9)
}
 0x1c6   :  { %515 = dma.vmem_to_hbm [thread:$0]  %s513_s22, 16, %s913_s5, [#allocation5]  }
 0x1c7   :  { %679 = dma.done.wait [#allocation5], 16  }
 0x1c8   :  { %680 = vsyncadd [#allocation5], 4294967280 }
 0x1c9   :  { %519 = vsyncpa [#allocation4], 1 }
 0x1ca   :  { %520 = vsyncpa [#allocation7], 1 }
 0x1cb   :  { %521 = vsyncpa [#allocation5], 1 }

// kernel: tpu_custom_call.1
= control target key start
LH: loop header
LB: loop body
LE: loop exit
PB: predicated region body
PF: predicated region fallthrough
CT: control target
= control target key end

     0   :  { %11 = vsyncpa [#allocation4], 0  ;;  %s908_s0 = inlined_call_operand.hbm [shape: f32[8,32], index: 0, kind: input, shape index: {}]   ;;  %s909_s1 = inlined_call_operand.hbm [shape: f32[32,64], index: 1, kind: input, shape index: {}]   ;;  %s910_s2 = inlined_call_operand.vmem [shape: f32[1,64], index: 2, kind: input, shape index: {}]   ;;  %s911_s3 = inlined_call_operand.vmem [shape: f32[1,64], index: 3, kind: input, shape index: {}]   ;;  %s912_s4 = inlined_call_operand.<no memory space> [shape: f32[1], index: 4, kind: input, shape index: {}]   ;;  %s913_s5 = inlined_call_operand.hbm [shape: f32[1,128], index: 5, kind: output, shape index: {}]  }
   0x1   :  { %12 = vsyncpa [#allocation7], 0 }
   0x2   :  { %13 = vsyncpa [#allocation5], 0 }
   0x3   :  { %18 = vsyncadd [#allocation4], 1920  ;;  %s681_s18 = smov [#allocation3]   ;;  %s609_s22 = scalar_lea.hbm %s908_s0, 128 }
   0x4   :  { %s19_s19 = sshll.u32 %s681_s18, 4  ;;  %p610_p0 = scmp.ne.s32.totalorder %s908_s0, %s609_s22  ;;  %s20_s19 = int_to_ptr.vmem [resolvable:$true] %s19_s19 }
   0x5   :  { %p613_p1 = scmp.lt.u32.totalorder %s609_s22, %s908_s0 }
   0x7   :  { %p615_p2 = pnand %p613_p1, %p610_p0 }
   0x9   :  { %618 = shalt.err (!%p615_p2)
}
   0xa   :  { %s619_s27 = scalar_lea.vmem %s20_s19, 128  ;;  %s623_s28 = scalar_lea.vmem %s20_s19, 2048 }
   0xb   :  { %p620_p3 = scmp.ne.s32.totalorder %s20_s19, %s619_s27  ;;  %p624_p4 = scmp.lt.s32.totalorder %s20_s19, %s20_s19 }
   0xc   :  { %p625_p5 = scmp.lt.s32.totalorder %s623_s28, %s619_s27 }
   0xe   :  { %p626_p6 = por %p625_p5, %p624_p4 }
  0x10   :  { %p627_p7 = pnand %p626_p6, %p620_p3 }
  0x12   :  { %630 = shalt.err (!%p627_p7)
}
  0x13   :  { %s682_s29 = smov 128   ;;  %s683_s30 = smov 8  }
  0x14   :  { %25 = dma.hbm_to_vmem [thread:$0]  %s908_s0, 128, %s20_s19, [#allocation4], %s682_s29, %s682_s29, %s683_s30  }
  0x15   :  { %s684_s8 = smov [#allocation6]   ;;  %s631_s12 = scalar_lea.hbm %s909_s1, 512 }
  0x16   :  { %s31_s9 = sshll.u32 %s684_s8, 4  ;;  %p632_p8 = scmp.ne.s32.totalorder %s909_s1, %s631_s12  ;;  %s32_s9 = int_to_ptr.vmem [resolvable:$true] %s31_s9 }
  0x17   :  { %p635_p9 = scmp.lt.u32.totalorder %s631_s12, %s909_s1 }
  0x19   :  { %p637_p10 = pnand %p635_p9, %p632_p8 }
  0x1b   :  { %640 = shalt.err (!%p637_p10)
}
  0x1c   :  { %s641_s17 = scalar_lea.vmem %s32_s9, 512  ;;  %p646_p12 = scmp.lt.s32.totalorder %s32_s9, %s32_s9 }
  0x1d   :  { %p642_p11 = scmp.ne.s32.totalorder %s32_s9, %s641_s17  ;;  %p647_p13 = scmp.lt.s32.totalorder %s641_s17, %s641_s17 }
  0x1f   :  { %p648_p0 = por %p647_p13, %p646_p12 }
  0x21   :  { %p649_p1 = pnand %p648_p0, %p642_p11 }
  0x23   :  { %652 = shalt.err (!%p649_p1)
}
  0x24   :  { %37 = dma.hbm_to_vmem [thread:$0]  %s909_s1, 512, %s32_s9, [#allocation7], %s682_s29, %s682_s29, %s683_s30  }
  0x25   :  { %675 = dma.done.wait [#allocation4], 2048  }
  0x26   :  { %676 = vsyncadd [#allocation4], 4294965248 }
  0x27   :  { %677 = dma.done.wait [#allocation7], 512  }
  0x28   :  { %678 = vsyncadd [#allocation7], 4294966784  ;;  %vm77_vm0 = vcmask 261120   ;;  %v66_v0 = vld [vmem:[#allocation6] sm:$0xff]  ;;  %v67_v1 = vld [vmem:[#allocation6 + $0x8] sm:$0xff]  ;;  %vm310_vm1 = vcmask 523264  }
  0x29   :  { %v68_v2 = vld [vmem:[#allocation6 + $0x10] sm:$0xff]  ;;  %v592_v3 = vpack.c.bf16 %v67_v1, %v66_v0  ;;  %v69_v4 = vld [vmem:[#allocation6 + $0x18] sm:$0xff]  ;;  %v50_v5 = vld [vmem:[#allocation3] sm:$0xff]  ;;  %vm404_vm2 = vcmask 130112   ;;  %vm411_vm3 = vcmask 195712   ;;  %vm418_vm4 = vcmask 261312  }
  0x2a   :  { %v58_v6 = vld [vmem:[#allocation3 + $0x40] sm:$0xff]  ;;  %v596_v7 = vpack.c.bf16 %v69_v4, %v68_v2  ;;  %568 = vmatprep.mubr.msk.f32.mxu0 %vm77_vm0, %v50_v5  ;;  %v51_v8 = vld [vmem:[#allocation3 + $0x8] sm:$0xff]  ;;  %v52_v10 = vld [vmem:[#allocation3 + $0x10] sm:$0xff]  ;;  %vm425_vm5 = vcmask 326912   ;;  %vm432_vm6 = vcmask 392512   ;;  %vm439_vm7 = vcmask 458112  }
  0x2b   :  { %580 = vmatprep.mubr.msk.f32.mxu1 %vm77_vm0, %v58_v6  ;;  %593 = vmatprep.subr.bf16.mxu0 %v592_v3  ;;  %v59_v9 = vld [vmem:[#allocation3 + $0x48] sm:$0xff]  ;;  %v60_v11 = vld [vmem:[#allocation3 + $0x50] sm:$0xff]  ;;  %v53_v12 = vld [vmem:[#allocation3 + $0x18] sm:$0xff]  ;;  %vm446_vm8 = vcmask 523712   ;;  %vm453_vm9 = vcmask 589312   ;;  %vm460_vm10 = vcmask 654912  }
  0x2c   :  { %600 = vmatprep.subr.bf16.mxu1 %v592_v3  ;;  %595 = vmatpush3.bf16.msra.mxu0 %v592_v3  ;;  %v61_v13 = vld [vmem:[#allocation3 + $0x58] sm:$0xff]  ;;  %v54_v14 = vld [vmem:[#allocation3 + $0x20] sm:$0xff]  ;;  %v55_v16 = vld [vmem:[#allocation3 + $0x28] sm:$0xff]  ;;  %vm467_vm11 = vcmask 720512   ;;  %vm474_vm12 = vcmask 786112   ;;  %vm481_vm13 = vcmask 851712  }
  0x2d   :  { %602 = vmatpush3.bf16.msra.mxu1 %v592_v3  ;;  %597 = vmatprep.subr.bf16.mxu0 %v596_v7  ;;  %v62_v15 = vld [vmem:[#allocation3 + $0x60] sm:$0xff]  ;;  %v63_v17 = vld [vmem:[#allocation3 + $0x68] sm:$0xff]  ;;  %v56_v18 = vld [vmem:[#allocation3 + $0x30] sm:$0xff]  ;;  %vm488_vm14 = vcmask 917312   ;;  %vm495_vm15 = vcmask 982912  }
  0x2e   :  { %601 = vmatprep.subr.bf16.mxu1 %v596_v7  ;;  %v64_v19 = vld [vmem:[#allocation3 + $0x70] sm:$0xff]  ;;  %v57_v20 = vld [vmem:[#allocation3 + $0x38] sm:$0xff]  ;;  %v759_v22 = vld [vmem:[%s910_s2] ss:$0 sm:$0xff] }
  0x2f   :  { %v65_v21 = vld [vmem:[#allocation3 + $0x78] sm:$0xff]  ;;  %v768_v31 = vld [vmem:[%s911_s3] ss:$0 sm:$0xff] }
  0x30   :  { %599 = vmatpush3.bf16.msra.mxu0 %v596_v7 }
  0x31   :  { %603 = vmatpush3.bf16.msra.mxu1 %v596_v7 }
  0x33   :  { %569 = vmatmul.mubr.msk.f32.vlgmr.msra.gmra.mrb[0].mxu0 %vm77_vm0, %v51_v8 }
  0x34   :  { %581 = vmatmul.mubr.msk.f32.vlgmr.msra.gmra.mrb[0].mxu1 %vm77_vm0, %v59_v9  ;;  %571 = vmatprep.mubr.msk.f32.mxu0 %vm77_vm0, %v52_v10 }
  0x35   :  { %583 = vmatprep.mubr.msk.f32.mxu1 %vm77_vm0, %v60_v11 }
  0x37   :  { %572 = vmatmul.mubr.msk.f32.gmra.mrb[2].mxu0 %vm77_vm0, %v53_v12 }
  0x38   :  { %584 = vmatmul.mubr.msk.f32.gmra.mrb[2].mxu1 %vm77_vm0, %v61_v13  ;;  %574 = vmatprep.mubr.msk.f32.mxu0 %vm77_vm0, %v54_v14 }
  0x39   :  { %586 = vmatprep.mubr.msk.f32.mxu1 %vm77_vm0, %v62_v15 }
  0x3b   :  { %575 = vmatmul.mubr.msk.f32.gmra.mrb[4].mxu0 %vm77_vm0, %v55_v16 }
  0x3c   :  { %587 = vmatmul.mubr.msk.f32.gmra.mrb[4].mxu1 %vm77_vm0, %v63_v17  ;;  %577 = vmatprep.mubr.msk.f32.mxu0 %vm77_vm0, %v56_v18 }
  0x3d   :  { %589 = vmatprep.mubr.msk.f32.mxu1 %vm77_vm0, %v64_v19 }
  0x3f   :  { %578 = vmatmul.mubr.msk.f32.gmra.mrb[6].mxu0 %vm77_vm0, %v57_v20 }
  0x40   :  { %590 = vmatmul.mubr.msk.f32.gmra.mrb[6].mxu1 %vm77_vm0, %v65_v21  ;;  %vm502_vm0 = vcmask 1048512  }
 0x106   :  { %v570_v23 = vpop.f32.mrb[0].mxu0 }
 0x107   :  { %v582_v24 = vpop.f32.mrb[0].mxu1  ;;  %v198_v25 = vadd.f32 %v570_v23, %v759_v22  ;;  %v192_v27 = vpop.f32.mrb[1].mxu0 }
 0x108   :  { %v238_v26 = vadd.f32 %v582_v24, %v759_v22  ;;  %v232_v28 = vpop.f32.mrb[1].mxu1  ;;  %v193_v29 = vadd.f32 %v759_v22, %v192_v27 }
 0x109   :  { %v233_v30 = vadd.f32 %v759_v22, %v232_v28  ;;  %v272_v32 = vmax.f32 %v198_v25, 0.0 }
 0x10a   :  { %v280_v33 = vmax.f32 %v238_v26, 0.0  ;;  %v271_v34 = vmax.f32 %v193_v29, 0.0  ;;  %v573_v35 = vpop.f32.mrb[2].mxu0 }
 0x10b   :  { %v585_v36 = vpop.f32.mrb[2].mxu1  ;;  %v208_v37 = vadd.f32 %v573_v35, %v759_v22  ;;  %v202_v38 = vpop.f32.mrb[3].mxu0  ;;  %v295_v41 = vmul.f32 %v768_v31, %v272_v32  ;;  %v279_v43 = vmax.f32 %v233_v30, 0.0 }
 0x10c   :  { %v303_v39 = vmul.f32 %v768_v31, %v280_v33  ;;  %v248_v40 = vadd.f32 %v585_v36, %v759_v22  ;;  %v242_v42 = vpop.f32.mrb[3].mxu1  ;;  %v203_v44 = vadd.f32 %v759_v22, %v202_v38  ;;  %v294_v46 = vmul.f32 %v768_v31, %v271_v34 }
 0x10d   :  { %v243_v45 = vadd.f32 %v759_v22, %v242_v42  ;;  %v274_v47 = vmax.f32 %v208_v37, 0.0  ;;  %v314_v50 = vsel %vm310_vm1, %v295_v41, 0.0  ;;  %v302_v59 = vmul.f32 %v768_v31, %v279_v43 }
 0x10e   :  { %v338_v48 = vsel %vm310_vm1, %v303_v39, 0.0  ;;  %v282_v49 = vmax.f32 %v248_v40, 0.0  ;;  %315 = vadd.xlane.f32.xlu0 %v314_v50  ;;  %v576_v51 = vpop.f32.mrb[4].mxu0  ;;  %v273_v60 = vmax.f32 %v203_v44, 0.0  ;;  %v311_v63 = vsel %vm310_vm1, %v294_v46, 0.0 }
 0x10f   :  { %339 = vadd.xlane.f32.xlu1 %v338_v48  ;;  %v588_v52 = vpop.f32.mrb[4].mxu1  ;;  %v297_v53 = vmul.f32 %v768_v31, %v274_v47  ;;  %v218_v54 = vadd.f32 %v576_v51, %v759_v22  ;;  %v212_v55 = vpop.f32.mrb[5].mxu0  ;;  %v281_v61 = vmax.f32 %v243_v45, 0.0  ;;  %v335_v9 = vsel %vm310_vm1, %v302_v59, 0.0 }
 0x110   :  { %v305_v56 = vmul.f32 %v768_v31, %v282_v49  ;;  %v252_v57 = vpop.f32.mrb[5].mxu1  ;;  %v213_v58 = vadd.f32 %v759_v22, %v212_v55  ;;  %v296_v10 = vmul.f32 %v768_v31, %v273_v60  ;;  %v258_v12 = vadd.f32 %v588_v52, %v759_v22 }
 0x111   :  { %v320_v62 = vsel %vm310_vm1, %v297_v53, 0.0  ;;  %v276_v2 = vmax.f32 %v218_v54, 0.0  ;;  %v304_v11 = vmul.f32 %v768_v31, %v281_v61  ;;  %v253_v13 = vadd.f32 %v759_v22, %v252_v57 }
 0x112   :  { %312 = vadd.xlane.f32.xlu0 %v311_v63  ;;  %v579_v0 = vpop.f32.mrb[6].mxu0  ;;  %v275_v3 = vmax.f32 %v213_v58, 0.0  ;;  %v344_v4 = vsel %vm310_vm1, %v305_v56, 0.0  ;;  %v317_v18 = vsel %vm310_vm1, %v296_v10, 0.0  ;;  %v284_v20 = vmax.f32 %v258_v12, 0.0 }
 0x113   :  { %321 = vadd.xlane.f32.xlu1 %v320_v62  ;;  %v591_v1 = vpop.f32.mrb[6].mxu1  ;;  %v228_v5 = vadd.f32 %v579_v0, %v759_v22  ;;  %v222_v6 = vpop.f32.mrb[7].mxu0  ;;  %v299_v16 = vmul.f32 %v768_v31, %v276_v2  ;;  %v341_v19 = vsel %vm310_vm1, %v304_v11, 0.0  ;;  %v283_v21 = vmax.f32 %v253_v13, 0.0 }
 0x114   :  { %v262_v7 = vpop.f32.mrb[7].mxu1  ;;  %v223_v8 = vadd.f32 %v759_v22, %v222_v6  ;;  %v298_v17 = vmul.f32 %v768_v31, %v275_v3  ;;  %v268_v23 = vadd.f32 %v591_v1, %v759_v22  ;;  %v307_v29 = vmul.f32 %v768_v31, %v284_v20 }
 0x115   :  { %v278_v14 = vmax.f32 %v228_v5, 0.0  ;;  %v263_v24 = vadd.f32 %v759_v22, %v262_v7  ;;  %v326_v25 = vsel %vm310_vm1, %v299_v16, 0.0  ;;  %v306_v30 = vmul.f32 %v768_v31, %v283_v21 }
 0x116   :  { %336 = vadd.xlane.f32.xlu0 %v335_v9  ;;  %v277_v15 = vmax.f32 %v223_v8, 0.0  ;;  %v323_v26 = vsel %vm310_vm1, %v298_v17, 0.0  ;;  %v286_v32 = vmax.f32 %v268_v23, 0.0  ;;  %v350_v35 = vsel %vm310_vm1, %v307_v29, 0.0 }
 0x117   :  { %345 = vadd.xlane.f32.xlu1 %v344_v4  ;;  %v301_v27 = vmul.f32 %v768_v31, %v278_v14  ;;  %v285_v33 = vmax.f32 %v263_v24, 0.0  ;;  %v347_v36 = vsel %vm310_vm1, %v306_v30, 0.0  ;;  %v393_v41 = vlaneseq }
 0x118   :  { %v300_v28 = vmul.f32 %v768_v31, %v277_v15  ;;  %v309_v37 = vmul.f32 %v768_v31, %v286_v32  ;;  %v824_v48 = vstv %s912_s4  ;;  %s685_s4 = smov [#allocation8]  }
 0x119   :  { %v332_v34 = vsel %vm310_vm1, %v301_v27, 0.0  ;;  %v308_v38 = vmul.f32 %v768_v31, %v285_v33  ;;  %v816_v44 = vand.u32 127, %v393_v41  ;;  %v818_v47 = vshrl.u32 %v393_v41, 7  ;;  %s512_s22 = sshll.u32 %s685_s4, 4  ;;  %s513_s22 = int_to_ptr.vmem [resolvable:$true] %s512_s22 }
 0x11a   :  { %342 = vadd.xlane.f32.xlu0 %v341_v19  ;;  %v329_v22 = vsel %vm310_vm1, %v300_v28, 0.0  ;;  %v356_v39 = vsel %vm310_vm1, %v309_v37, 0.0  ;;  %s653_s23 = scalar_lea.vmem %s513_s22, 16  ;;  %s657_s24 = scalar_lea.vmem %s513_s22, 32 }
 0x11b   :  { %318 = vadd.xlane.f32.xlu1 %v317_v18  ;;  %v353_v40 = vsel %vm310_vm1, %v308_v38, 0.0  ;;  %v399_v31 = vadd.s32 4294967288, %v816_v44  ;;  %v406_v49 = vadd.s32 4294967280, %v816_v44  ;;  %v397_v50 = vsub.s32 %v816_v44, %v818_v47  ;;  %p654_p2 = scmp.ne.s32.totalorder %s513_s22, %s653_s23  ;;  %p658_p3 = scmp.lt.s32.totalorder %s513_s22, %s513_s22 }
 0x11c   :  { %v833_v54 = vadd.s32 4294967224, %v816_v44  ;;  %v413_v55 = vadd.s32 4294967272, %v816_v44  ;;  %v839_v58 = vadd.s32 4294967232, %v816_v44  ;;  %v420_v60 = vadd.s32 4294967264, %v816_v44  ;;  %p659_p4 = scmp.lt.s32.totalorder %s657_s24, %s653_s23 }
 0x11d   :  { %v402_v56 = vsub.s32 %v399_v31, %v818_v47  ;;  %v409_v59 = vsub.s32 %v406_v49, %v818_v47  ;;  %v844_v62 = vadd.s32 4294967208, %v816_v44  ;;  %v847_v0 = vadd.s32 4294967216, %v816_v44 }
 0x11e   :  { %324 = vadd.xlane.f32.xlu0 %v323_v26  ;;  %v427_v2 = vadd.s32 4294967256, %v816_v44  ;;  %v458_v3 = vsub.s32 %v833_v54, %v818_v47  ;;  %v416_v4 = vsub.s32 %v413_v55, %v818_v47  ;;  %v441_v8 = vadd.s32 4294967240, %v816_v44  ;;  %p660_p5 = por %p659_p4, %p658_p3 }
 0x11f   :  { %327 = vadd.xlane.f32.xlu1 %v326_v25  ;;  %v451_v9 = vsub.s32 %v839_v58, %v818_v47  ;;  %v423_v11 = vsub.s32 %v420_v60, %v818_v47  ;;  %v434_v12 = vadd.s32 4294967248, %v816_v44  ;;  %v472_v14 = vsub.s32 %v844_v62, %v818_v47 }
 0x120   :  { %v465_v15 = vsub.s32 %v847_v0, %v818_v47  ;;  %v430_v16 = vsub.s32 %v427_v2, %v818_v47  ;;  %v444_v24 = vsub.s32 %v441_v8, %v818_v47  ;;  %v483_v25 = vadd.s32 4294967192, %v816_v44  ;;  %p661_p6 = pnand %p660_p5, %p654_p2 }
 0x121   :  { %v437_v27 = vsub.s32 %v434_v12, %v818_v47  ;;  %v476_v33 = vadd.s32 4294967200, %v816_v44 }
 0x122   :  { %330 = vadd.xlane.f32.xlu0 %v329_v22  ;;  %v486_v38 = vsub.s32 %v483_v25, %v818_v47 }
 0x123   :  { %333 = vadd.xlane.f32.xlu1 %v332_v34 }
 0x126   :  { %348 = vadd.xlane.f32.xlu0 %v347_v36 }
 0x127   :  { %351 = vadd.xlane.f32.xlu1 %v350_v35 }
 0x12a   :  { %354 = vadd.xlane.f32.xlu0 %v353_v40 }
 0x12b   :  { %357 = vadd.xlane.f32.xlu1 %v356_v39  ;;  %v497_v39 = vadd.s32 4294967176, %v816_v44 }
 0x12d   :  { %v500_v58 = vsub.s32 %v497_v39, %v818_v47 }
 0x19b   :  { %v316_v43 = vpop.xlane.xlu0 %315 }
 0x19c   :  { %v814_v42 = vpop.xlane.xlu1 %339  ;;  %v362_v57 = vadd.f32 %v824_v48, %v316_v43 }
 0x19d   :  { %v370_v37 = vadd.f32 %v824_v48, %v814_v42  ;;  %v479_v42 = vsub.s32 %v476_v33, %v818_v47 }
 0x19e   :  { %v403_v6 = vrot.slane %v362_v57, %v402_v56 }
 0x19f   :  { %v313_v46 = vpop.xlane.xlu0 %312  ;;  %v459_v55 = vrot.slane %v370_v37, %v458_v3 }
 0x1a0   :  { %v322_v45 = vpop.xlane.xlu1 %321  ;;  %v361_v51 = vadd.f32 %v824_v48, %v313_v46 }
 0x1a1   :  { %v364_v7 = vadd.f32 %v824_v48, %v322_v45  ;;  %v490_v45 = vadd.s32 4294967184, %v816_v44 }
 0x1a2   :  { %v398_v61 = vrot.slane %v361_v51, %v397_v50 }
 0x1a3   :  { %v337_v53 = vpop.xlane.xlu0 %336  ;;  %v417_v23 = vrot.slane %v364_v7, %v416_v4 }
 0x1a4   :  { %v830_v52 = vpop.xlane.xlu1 %345  ;;  %v405_v13 = vsel %vm404_vm2, %v403_v6, %v398_v61  ;;  %v369_v34 = vadd.f32 %v824_v48, %v337_v53 }
 0x1a5   :  { %v372_v46 = vadd.f32 %v824_v48, %v830_v52 }
 0x1a6   :  { %v452_v51 = vrot.slane %v369_v34, %v451_v9 }
 0x1a7   :  { %v343_v1 = vpop.xlane.xlu0 %342  ;;  %v473_v60 = vrot.slane %v372_v46, %v472_v14 }
 0x1a8   :  { %v319_v63 = vpop.xlane.xlu1 %318  ;;  %v371_v40 = vadd.f32 %v824_v48, %v343_v1 }
 0x1a9   :  { %v363_v5 = vadd.f32 %v824_v48, %v319_v63 }
 0x1aa   :  { %v466_v52 = vrot.slane %v371_v40, %v465_v15 }
 0x1ab   :  { %v410_v10 = vrot.slane %v363_v5, %v409_v59  ;;  %v325_v18 = vpop.xlane.xlu0 %324  ;;  %v493_v59 = vsub.s32 %v490_v45, %v818_v47 }
 0x1ac   :  { %v328_v17 = vpop.xlane.xlu1 %327  ;;  %v365_v21 = vadd.f32 %v824_v48, %v325_v18 }
 0x1ad   :  { %v412_v19 = vsel %vm411_vm3, %v410_v10, %v405_v13  ;;  %v366_v20 = vadd.f32 %v824_v48, %v328_v17 }
 0x1ae   :  { %v424_v26 = vrot.slane %v365_v21, %v423_v11  ;;  %v419_v29 = vsel %vm418_vm4, %v417_v23, %v412_v19 }
 0x1af   :  { %v431_v28 = vrot.slane %v366_v20, %v430_v16  ;;  %v331_v32 = vpop.xlane.xlu0 %330 }
 0x1b0   :  { %v334_v30 = vpop.xlane.xlu1 %333  ;;  %v426_v22 = vsel %vm425_vm5, %v424_v26, %v419_v29  ;;  %v367_v36 = vadd.f32 %v824_v48, %v331_v32 }
 0x1b1   :  { %v368_v35 = vadd.f32 %v824_v48, %v334_v30  ;;  %v433_v31 = vsel %vm432_vm6, %v431_v28, %v426_v22 }
 0x1b2   :  { %v438_v43 = vrot.slane %v367_v36, %v437_v27 }
 0x1b3   :  { %v445_v41 = vrot.slane %v368_v35, %v444_v24  ;;  %v349_v50 = vpop.xlane.xlu0 %348 }
 0x1b4   :  { %v352_v49 = vpop.xlane.xlu1 %351  ;;  %v440_v53 = vsel %vm439_vm7, %v438_v43, %v433_v31  ;;  %v373_v54 = vadd.f32 %v824_v48, %v349_v50 }
 0x1b5   :  { %v447_v56 = vsel %vm446_vm8, %v445_v41, %v440_v53  ;;  %v374_v44 = vadd.f32 %v824_v48, %v352_v49 }
 0x1b6   :  { %v454_v57 = vsel %vm453_vm9, %v452_v51, %v447_v56  ;;  %v480_v1 = vrot.slane %v373_v54, %v479_v42 }
 0x1b7   :  { %v461_v61 = vsel %vm460_vm10, %v459_v55, %v454_v57  ;;  %v355_v63 = vpop.xlane.xlu0 %354  ;;  %v487_v4 = vrot.slane %v374_v44, %v486_v38 }
 0x1b8   :  { %v358_v62 = vpop.xlane.xlu1 %357  ;;  %v468_v0 = vsel %vm467_vm11, %v466_v52, %v461_v61  ;;  %v375_v3 = vadd.f32 %v824_v48, %v355_v63 }
 0x1b9   :  { %v376_v2 = vadd.f32 %v824_v48, %v358_v62  ;;  %v475_v5 = vsel %vm474_vm12, %v473_v60, %v468_v0 }
 0x1ba   :  { %v482_v47 = vsel %vm481_vm13, %v480_v1, %v475_v5  ;;  %v494_v7 = vrot.slane %v375_v3, %v493_v59 }
 0x1bb   :  { %v501_v6 = vrot.slane %v376_v2, %v500_v58  ;;  %v489_v8 = vsel %vm488_vm14, %v487_v4, %v482_v47 }
 0x1bc   :  { %v496_v9 = vsel %vm495_vm15, %v494_v7, %v489_v8 }
 0x1bd   :  { %v503_v10 = vsel %vm502_vm0, %v501_v6, %v496_v9 }
 0x1be   :  { %505 = vst [vmem:[#allocation8] sm:$0x1] %v503_v10 }
 0x1bf   :  { %664 = shalt.err (!%p661_p6)
}
 0x1c0   :  { %s665_s27 = scalar_lea.hbm %s913_s5, 16 }
 0x1c1   :  { %p666_p7 = scmp.ne.s32.totalorder %s913_s5, %s665_s27  ;;  %p669_p8 = scmp.lt.u32.totalorder %s665_s27, %s913_s5 }
 0x1c3   :  { %p671_p9 = pnand %p669_p8, %p666_p7 }
 0x1c5   :  { %674 = shalt.err (!%p671_p9)
}
 0x1c6   :  { %515 = dma.vmem_to_hbm [thread:$0]  %s513_s22, 16, %s913_s5, [#allocation5]  }
 0x1c7   :  { %679 = dma.done.wait [#allocation5], 16  }
 0x1c8   :  { %680 = vsyncadd [#allocation5], 4294967280 }
 0x1c9   :  { %519 = vsyncpa [#allocation4], 1 }
 0x1ca   :  { %520 = vsyncpa [#allocation7], 1 }
 0x1cb   :  { %521 = vsyncpa [#allocation5], 1 }

</bundles_post_ra>
